<compile_context>
chip_gen: v7x
topology: tpu7x:2x2x1
jax: 0.10.0
libtpu: 0.0.40
codegen_flags: <defaults>
</compile_context>

<pallas_src>
import jax
import jax.numpy as jnp
from jax import lax
from jax.experimental import pallas as pl
from jax.experimental.pallas import tpu as pltpu

IN_DIM = 60        # real feature / hidden width of the PyTorch module
H_PAD = 64         # padded hidden width (sublane/lane friendly)
MAX_TILE_B = 2048  # max batch rows per grid step
ROW_W4 = 3         # row of the packed slab holding the output-layer weights
ROW_B4 = 4         # row of the packed slab holding the output-layer bias


def _mlp_kernel(x_ref, w1_ref, w23_ref, p_ref, o_ref):
    """One batch tile of the fused 4-layer MLP.

    x_ref   : (TB, 60)    f32 activations (natural width, no wrapper pad)
    w1_ref  : (60, 64)    bf16 layer-1 weight, (in, out), cols 60..63 == 0
    w23_ref : (2, 64, 64) bf16 layer-2/3 weights, zero padded
    p_ref   : (8, 64)     f32: rows 0..2 = b1..b3, row 3 = w4 row, row 4 = [b4,0..]
    o_ref   : (8, TB)     f32 lane-dense result; row ROW_W4 holds the logits
    """
    # Layer 1: (TB,60) x (60,64), bf16 operands, f32 accumulation.
    h = jnp.dot(x_ref[...].astype(jnp.bfloat16), w1_ref[...],
                preferred_element_type=jnp.float32)
    h = jnp.maximum(h + p_ref[0:1, :], 0.0)        # f32 bias + ReLU

    # Layers 2..3: (TB,64) x (64,64).  Padded columns stay exactly 0 because
    # the padded weight rows/cols and padded bias entries are 0.
    for i in range(2):
        h = jnp.dot(h.astype(jnp.bfloat16), w23_ref[i],
                    preferred_element_type=jnp.float32)
        h = jnp.maximum(h + p_ref[i + 1:i + 2, :], 0.0)

    # Final 60->1 layer: contract the packed slab (8,64) with h (TB,64) along
    # the feature axis -> (8, TB).  "nt" matmul (rhs contracts on its minor
    # dim, like q @ k.T), keeping the store lane-dense.  Row ROW_W4 is w4 . h;
    # the other rows are discarded by the wrapper.
    logits8 = lax.dot_general(
        p_ref[...].astype(jnp.bfloat16), h.astype(jnp.bfloat16),
        (((1,), (1,)), ((), ())), preferred_element_type=jnp.float32)
    b4 = p_ref[ROW_B4:ROW_B4 + 1, 0:1]             # (1,1); broadcast add is harmless
    o_ref[...] = (logits8 + b4).astype(o_ref.dtype)


def pack_params(params):
    """Pack the 9 tensors into bf16 weight slabs + one f32 (8,64) misc slab."""
    w1 = jnp.zeros((IN_DIM, H_PAD), jnp.float32).at[:, :IN_DIM].set(params["w1"])
    w23 = jnp.zeros((2, H_PAD, H_PAD), jnp.float32)
    p = jnp.zeros((8, H_PAD), jnp.float32)
    p = p.at[0, :IN_DIM].set(params["b1"])
    for i in range(2):
        w23 = w23.at[i, :IN_DIM, :IN_DIM].set(params[f"w{i + 2}"])
        p = p.at[i + 1, :IN_DIM].set(params[f"b{i + 2}"])
    p = p.at[ROW_W4, :IN_DIM].set(params["w4"][:, 0])
    p = p.at[ROW_B4, 0].set(params["b4"][0])
    return w1.astype(jnp.bfloat16), w23.astype(jnp.bfloat16), p


def _pick_tile(batch):
    """Batch tile: multiple of 128, <= MAX_TILE_B, and giving >= 2 grid steps
    whenever batch allows (keeps both v7x TensorCores busy)."""
    half = pl.cdiv(batch, 2)
    return min(MAX_TILE_B, max(128, ((half + 127) // 128) * 128))


@jax.jit
def sonar_classifier_forward(x, w1, w23, p):
    """x: (B, 60) float32.  Returns (B, 1) logits matching the PyTorch module."""
    B = x.shape[0]
    tile_b = _pick_tile(B)
    num_tiles = pl.cdiv(B, tile_b)
    b_pad = num_tiles * tile_b

    # Pad only the batch dim, and only when needed (no feature-dim pad copy).
    x_in = x if b_pad == B else jnp.pad(x, ((0, b_pad - B), (0, 0)))

    flops = 2 * b_pad * (IN_DIM * H_PAD + 2 * H_PAD * H_PAD + 8 * H_PAD)
    bytes_accessed = (x_in.size * 4 + (w1.size + w23.size) * 2
                      + p.size * 4 + 8 * b_pad * 4)

    out = pl.pallas_call(
        _mlp_kernel,
        out_shape=jax.ShapeDtypeStruct((8, b_pad), jnp.float32),
        grid=(num_tiles,),
        in_specs=[
            pl.BlockSpec((tile_b, IN_DIM), lambda i: (i, 0)),       # x batch tile
            pl.BlockSpec((IN_DIM, H_PAD), lambda i: (0, 0)),        # w1, resident
            pl.BlockSpec((2, H_PAD, H_PAD), lambda i: (0, 0, 0)),   # w2/w3, resident
            pl.BlockSpec((8, H_PAD), lambda i: (0, 0)),             # biases + w4/b4
        ],
        out_specs=pl.BlockSpec((8, tile_b), lambda i: (0, i)),      # lane-dense slab
        compiler_params=pltpu.CompilerParams(
            dimension_semantics=("parallel",)),
        cost_estimate=pl.CostEstimate(
            flops=flops, transcendentals=0, bytes_accessed=bytes_accessed),
    )(x_in, w1, w23, p)

    return out[ROW_W4, :B].reshape(B, 1)


def init_params(key):
    """Deterministic init mirroring nn.Linear defaults (U(+/- 1/sqrt(fan_in)))."""
    dims = [(60, 60), (60, 60), (60, 60), (60, 1)]
    params = {}
    keys = jax.random.split(key, 2 * len(dims))
    for i, (fan_in, fan_out) in enumerate(dims):
        bound = 1.0 / (fan_in ** 0.5)
        params[f"w{i + 1}"] = jax.random.uniform(
            keys[2 * i], (fan_in, fan_out), jnp.float32, minval=-bound, maxval=bound)
        params[f"b{i + 1}"] = jax.random.uniform(
            keys[2 * i + 1], (fan_out,), jnp.float32, minval=-bound, maxval=bound)
    return params


def reference_forward(x, params):
    h = jnp.maximum(x @ params["w1"] + params["b1"], 0.0)
    h = jnp.maximum(h @ params["w2"] + params["b2"], 0.0)
    h = jnp.maximum(h @ params["w3"] + params["b3"], 0.0)
    return h @ params["w4"] + params["b4"]


if __name__ == "__main__":
    key = jax.random.PRNGKey(0)
    pkey, xkey1, xkey2 = jax.random.split(key, 3)
    params = init_params(pkey)
    w1, w23, p = pack_params(params)

    ok = True
    # B=208 (sonar dataset size): 2 grid steps with a batch-padded last tile.
    # B=1024: 2 grid steps, no batch padding at all.
    for B, xkey in ((208, xkey1), (1024, xkey2)):
        x = jax.random.normal(xkey, (B, IN_DIM), jnp.float32)
        out = sonar_classifier_forward(x, w1, w23, p)
        jax.block_until_ready(out)
        ref = reference_forward(x, params)
        ok &= out.shape == (B, 1)
        # bf16 matmul operands (f32 accumulation) -> relaxed tolerance.
        ok &= bool(jnp.allclose(out, ref, atol=3e-2, rtol=3e-2))

    if ok:
        print("KERNEL_OK")
</pallas_src>

<mosaic_0001>
module attributes {stable_mosaic.version = 11 : i64} {
  func.func @_mlp_kernel(%arg0: i32, %arg1: memref<128x60xf32, #tpu.memory_space<vmem>>, %arg2: memref<60x64xbf16, #tpu.memory_space<vmem>>, %arg3: memref<2x64x64xbf16, #tpu.memory_space<vmem>>, %arg4: memref<8x64xf32, #tpu.memory_space<vmem>>, %arg5: memref<8x128xf32, #tpu.memory_space<vmem>>) attributes {dimension_semantics = [#tpu.dimension_semantics<parallel>], iteration_bounds = array<i64: 2>, scalar_prefetch = 0 : i64, scratch_operands = 0 : i64, tpu.core_type = #tpu.core_type<tc>, window_params = [{transform_indices = @transform_0, window_bounds = array<i64: 128, 60>}, {pipeline_mode = #tpu.pipeline_mode<synchronous>, transform_indices = @transform_1, window_bounds = array<i64: 60, 64>}, {pipeline_mode = #tpu.pipeline_mode<synchronous>, transform_indices = @transform_2, window_bounds = array<i64: 2, 64, 64>}, {pipeline_mode = #tpu.pipeline_mode<synchronous>, transform_indices = @transform_3, window_bounds = array<i64: 8, 64>}, {transform_indices = @transform_4, window_bounds = array<i64: 8, 128>}]} {
    %c0 = arith.constant 0 : index
    %c0_0 = arith.constant 0 : index
    %0 = vector.load %arg1[%c0, %c0_0] : memref<128x60xf32, #tpu.memory_space<vmem>>, vector<128x60xf32>
    %1 = arith.truncf %0 : vector<128x60xf32> to vector<128x60xbf16>
    %c0_1 = arith.constant 0 : index
    %c0_2 = arith.constant 0 : index
    %2 = vector.load %arg2[%c0_1, %c0_2] : memref<60x64xbf16, #tpu.memory_space<vmem>>, vector<60x64xbf16>
    %cst = arith.constant dense<0.000000e+00> : vector<128x64xf32>
    %3 = tpu.matmul %1, %2, %cst {dimension_numbers = #tpu.dot_dimension_numbers<[1], [0], [0], [1], [0, 0, 1, 1], [], []>} : vector<128x60xbf16>, vector<60x64xbf16>, vector<128x64xf32> -> vector<128x64xf32>
    %c0_3 = arith.constant 0 : index
    %c0_4 = arith.constant 0 : index
    %4 = vector.load %arg4[%c0_3, %c0_4] : memref<8x64xf32, #tpu.memory_space<vmem>>, vector<1x64xf32>
    %5 = vector.broadcast %4 : vector<1x64xf32> to vector<128x64xf32>
    %6 = arith.addf %3, %5 : vector<128x64xf32>
    %cst_5 = arith.constant 0.000000e+00 : f32
    %7 = vector.broadcast %cst_5 : f32 to vector<128x64xf32>
    %8 = arith.maximumf %6, %7 : vector<128x64xf32>
    %9 = arith.truncf %8 : vector<128x64xf32> to vector<128x64xbf16>
    %c0_6 = arith.constant 0 : index
    %c0_7 = arith.constant 0 : index
    %c0_8 = arith.constant 0 : index
    %10 = vector.load %arg3[%c0_6, %c0_7, %c0_8] : memref<2x64x64xbf16, #tpu.memory_space<vmem>>, vector<1x64x64xbf16>
    %11 = vector.shape_cast %10 : vector<1x64x64xbf16> to vector<64x64xbf16>
    %cst_9 = arith.constant dense<0.000000e+00> : vector<128x64xf32>
    %12 = tpu.matmul %9, %11, %cst_9 {dimension_numbers = #tpu.dot_dimension_numbers<[1], [0], [0], [1], [0, 0, 1, 1], [], []>} : vector<128x64xbf16>, vector<64x64xbf16>, vector<128x64xf32> -> vector<128x64xf32>
    %c1 = arith.constant 1 : index
    %c0_10 = arith.constant 0 : index
    %13 = vector.load %arg4[%c1, %c0_10] : memref<8x64xf32, #tpu.memory_space<vmem>>, vector<1x64xf32>
    %14 = vector.broadcast %13 : vector<1x64xf32> to vector<128x64xf32>
    %15 = arith.addf %12, %14 : vector<128x64xf32>
    %cst_11 = arith.constant 0.000000e+00 : f32
    %16 = vector.broadcast %cst_11 : f32 to vector<128x64xf32>
    %17 = arith.maximumf %15, %16 : vector<128x64xf32>
    %18 = arith.truncf %17 : vector<128x64xf32> to vector<128x64xbf16>
    %c1_12 = arith.constant 1 : index
    %c0_13 = arith.constant 0 : index
    %c0_14 = arith.constant 0 : index
    %19 = vector.load %arg3[%c1_12, %c0_13, %c0_14] : memref<2x64x64xbf16, #tpu.memory_space<vmem>>, vector<1x64x64xbf16>
    %20 = vector.shape_cast %19 : vector<1x64x64xbf16> to vector<64x64xbf16>
    %cst_15 = arith.constant dense<0.000000e+00> : vector<128x64xf32>
    %21 = tpu.matmul %18, %20, %cst_15 {dimension_numbers = #tpu.dot_dimension_numbers<[1], [0], [0], [1], [0, 0, 1, 1], [], []>} : vector<128x64xbf16>, vector<64x64xbf16>, vector<128x64xf32> -> vector<128x64xf32>
    %c2 = arith.constant 2 : index
    %c0_16 = arith.constant 0 : index
    %22 = vector.load %arg4[%c2, %c0_16] : memref<8x64xf32, #tpu.memory_space<vmem>>, vector<1x64xf32>
    %23 = vector.broadcast %22 : vector<1x64xf32> to vector<128x64xf32>
    %24 = arith.addf %21, %23 : vector<128x64xf32>
    %cst_17 = arith.constant 0.000000e+00 : f32
    %25 = vector.broadcast %cst_17 : f32 to vector<128x64xf32>
    %26 = arith.maximumf %24, %25 : vector<128x64xf32>
    %c0_18 = arith.constant 0 : index
    %c0_19 = arith.constant 0 : index
    %27 = vector.load %arg4[%c0_18, %c0_19] : memref<8x64xf32, #tpu.memory_space<vmem>>, vector<8x64xf32>
    %28 = arith.truncf %27 : vector<8x64xf32> to vector<8x64xbf16>
    %29 = arith.truncf %26 : vector<128x64xf32> to vector<128x64xbf16>
    %cst_20 = arith.constant dense<0.000000e+00> : vector<8x128xf32>
    %30 = tpu.matmul %28, %29, %cst_20 {dimension_numbers = #tpu.dot_dimension_numbers<[1], [1], [0], [0], [0, 0, 1, 0], [], []>} : vector<8x64xbf16>, vector<128x64xbf16>, vector<8x128xf32> -> vector<8x128xf32>
    %c4 = arith.constant 4 : index
    %c0_21 = arith.constant 0 : index
    %31 = vector.load %arg4[%c4, %c0_21] : memref<8x64xf32, #tpu.memory_space<vmem>>, vector<1x1xf32>
    %32 = vector.broadcast %31 : vector<1x1xf32> to vector<8x128xf32>
    %33 = arith.addf %30, %32 : vector<8x128xf32>
    %c0_22 = arith.constant 0 : index
    %c0_23 = arith.constant 0 : index
    %34 = vector.load %arg5[%c0_22, %c0_23] : memref<8x128xf32, #tpu.memory_space<vmem>>, vector<8x128xf32>
    tpu.vector_store %arg5[%c0_22, %c0_23], %33 {strides = array<i32>} : memref<8x128xf32, #tpu.memory_space<vmem>>, vector<8x128xf32>,
    return
  }
  func.func @transform_0(%arg0: i32) -> (i32, i32) {
    %c0_i32 = arith.constant 0 : i32
    %c0_i32_0 = arith.constant 0 : i32
    return %arg0, %c0_i32 : i32, i32
  }
  func.func @transform_1(%arg0: i32) -> (i32, i32) {
    %c0_i32 = arith.constant 0 : i32
    %c0_i32_0 = arith.constant 0 : i32
    %c0_i32_1 = arith.constant 0 : i32
    return %c0_i32, %c0_i32_0 : i32, i32
  }
  func.func @transform_2(%arg0: i32) -> (i32, i32, i32) {
    %c0_i32 = arith.constant 0 : i32
    %c0_i32_0 = arith.constant 0 : i32
    %c0_i32_1 = arith.constant 0 : i32
    %c0_i32_2 = arith.constant 0 : i32
    return %c0_i32, %c0_i32_0, %c0_i32_1 : i32, i32, i32
  }
  func.func @transform_3(%arg0: i32) -> (i32, i32) {
    %c0_i32 = arith.constant 0 : i32
    %c0_i32_0 = arith.constant 0 : i32
    %c0_i32_1 = arith.constant 0 : i32
    return %c0_i32, %c0_i32_0 : i32, i32
  }
  func.func @transform_4(%arg0: i32) -> (i32, i32) {
    %c0_i32 = arith.constant 0 : i32
    %c0_i32_0 = arith.constant 0 : i32
    return %c0_i32, %arg0 : i32, i32
  }
}

</mosaic_0001>

<bundles_post_ra>
// kernel: sonar_classifier_forward.1
= control target key start
LH: loop header
LB: loop body
LE: loop exit
PB: predicated region body
PF: predicated region fallthrough
CT: control target
= control target key end

     0   :  { %s1158_s15 = smov 0   ;;  %s1291_s0 = inlined_call_operand.vmem [shape: f32[256,60], index: 0, kind: input, shape index: {}]   ;;  %s1292_s1 = inlined_call_operand.vmem [shape: bf16[60,64], index: 1, kind: input, shape index: {}]   ;;  %s1293_s2 = inlined_call_operand.vmem [shape: bf16[2,64,64], index: 2, kind: input, shape index: {}]   ;;  %s1294_s3 = inlined_call_operand.vmem [shape: f32[8,64], index: 3, kind: input, shape index: {}]   ;;  %s1295_s4 = inlined_call_operand.vmem [shape: f32[8,256], index: 4, kind: output, shape index: {}]  }
   0x1 LB: > { %s1164_s16 = sadd.s32 4294967295, %s1129_s15   ;;  %p907_p0 = scmp.ge.s32.totalorder %s1129_s15, 1  ;;  %s1129_s15 = sphi %s1158_s15, %s14_s15  }
   0x2   : > { %p163_p1 = scmp.lt.s32.totalorder %s1129_s15, 3 }
   0x4   : > { %p164_p2 = pnand %p907_p0, %p163_p1 }
   0x5   : > { %v1111_v0 = vld [vmem:[%s1292_s1] sm:$0xff] (!%p164_p2)   ;;  %v1112_v1 = vld [vmem:[%s1292_s1 + $0x8] sm:$0xff] (!%p164_p2)   ;;  %s908_s21 = sshll.u32 (!%p164_p2), %s1164_s16, 4  ;;  %v1113_v2 = vld [vmem:[%s1292_s1 + $0x10] sm:$0xff] (!%p164_p2)   ;;  %vm259_vm0 = vcmask (!%p164_p2), 490496   ;;  %vm284_vm1 = vcmask (!%p164_p2), 1045504  }
   0x6   : > { %167 = sbr.rel (%p164_p2) target bundleno = 966 (0x3c6), region = 36  ;;  %1006 = vmatprep.subr.bf16.mxu0 (!%p164_p2), %v1111_v0  ;;  %p189_p3 = scmp.lt.s32.totalorder (!%p164_p2), %s908_s21, 31  ;;  %v1115_v3 = vld [vmem:[%s1293_s2] sm:$0xff] (!%p164_p2)   ;;  %v1116_v4 = vld [vmem:[%s1293_s2 + $0x8] sm:$0xff] (!%p164_p2)   ;;  %v1114_v5 = vld [vmem:[%s1292_s1 + $0x18] sm:$0x3f] (!%p164_p2)  }
   0x7   : > { %1007 = vmatpush3.bf16.msra.mxu0 (!%p164_p2), %v1111_v0  ;;  %1030 = vmatprep.subr.bf16.mxu1 (!%p164_p2), %v1115_v3  ;;  %v286_v11 = vsel (!%p164_p2), %vm284_vm1, %v1114_v5, 0  ;;  %v1117_v31 = vld [vmem:[%s1293_s2 + $0x10] sm:$0xff] (!%p164_p2)   ;;  %v1118_v32 = vld [vmem:[%s1293_s2 + $0x18] sm:$0xff] (!%p164_p2)   ;;  %v1119_v33 = vld [vmem:[%s1293_s2 + $0x20] sm:$0xff] (!%p164_p2)   ;;  %vm446_vm2 = vcmask (!%p164_p2), 523264   ;;  %vm1132_vm3 = vmmov (!%p164_p2), 0  }
   0x8   : > { %1008 = vmatprep.subr.bf16.mxu0 (!%p164_p2), %v1112_v1  ;;  %1031 = vmatpush3.bf16.msra.mxu1 (!%p164_p2), %v1115_v3  ;;  %v1120_v34 = vld [vmem:[%s1293_s2 + $0x28] sm:$0xff] (!%p164_p2)   ;;  %v1121_v35 = vld [vmem:[%s1293_s2 + $0x30] sm:$0xff] (!%p164_p2)   ;;  %v911_v36 = vld [vmem:[%s1294_s3] ss:$0 sm:$0xff] (!%p164_p2)  ;;  %p194_p4 = scmp.lt.s32.totalorder (!%p164_p2), %s1164_s16, 1 }
   0x9   : > { %1032 = vmatprep.subr.bf16.mxu1 (!%p164_p2), %v1116_v4 }
   0xb   : > { %1009 = vmatpush3.bf16.msra.mxu0 (!%p164_p2), %v1112_v1 }
   0xc   : > { %1010 = vmatprep.subr.bf16.mxu0 (!%p164_p2), %v1113_v2  ;;  %1033 = vmatpush3.bf16.msra.mxu1 (!%p164_p2), %v1116_v4 }
   0xd   : > { %s1297_s21 = smov (!%p189_p3, %s908_s21), 31  ;;  %1034 = vmatprep.subr.bf16.mxu1 %v1117_v31  ;;  %s1299_s16 = smov (!%p194_p4, %s1164_s16), 1 }
   0xe   : > { %s909_s26 = sshll.u32 %s1297_s21, 3  ;;  %s910_s7 = sshll.u32 %s1299_s16, 3 }
   0xf   : > { %s1187_s5 = scalar_lea.vmem %s1291_s0, %s909_s26  ;;  %1011 = vmatpush3.bf16.msra.mxu0 %v1113_v2  ;;  %s197_s10 = scalar_lea.vmem %s1295_s4, %s910_s7 }
  0x10   : > { %v199_v6 = vld [vmem:[%s1187_s5] sm:$0xff]  ;;  %v200_v7 = vld [vmem:[%s1187_s5 + $0x8] sm:$0xff]  ;;  %v201_v9 = vld [vmem:[%s1187_s5 + $0x10] sm:$0xff]  ;;  %1098 = vmatprep.subr.msk.bf16.mxu0 %vm284_vm1, %v1114_v5  ;;  %1035 = vmatpush3.bf16.msra.mxu1 %v1117_v31 }
  0x11   : > { %v215_v8 = vpack.c.bf16 %v200_v7, %v199_v6  ;;  %v202_v10 = vld [vmem:[%s1187_s5 + $0x18] sm:$0xff]  ;;  %v203_v12 = vld [vmem:[%s1187_s5 + $0x20] sm:$0xff]  ;;  %v204_v13 = vld [vmem:[%s1187_s5 + $0x28] sm:$0xff]  ;;  %1036 = vmatprep.subr.bf16.mxu1 %v1118_v32 }
  0x12   : > { %v216_v14 = vpack.c.bf16 %v202_v10, %v201_v9  ;;  %v217_v15 = vpack.c.bf16 %v204_v13, %v203_v12  ;;  %v205_v16 = vld [vmem:[%s1187_s5 + $0x30] sm:$0xff]  ;;  %v206_v17 = vld [vmem:[%s1187_s5 + $0x38] sm:$0xff]  ;;  %v207_v18 = vld [vmem:[%s1187_s5 + $0x40] sm:$0xff] }
  0x13   : > { %1014 = vmatprep.mubr.msk.bf16.mxu0 %vm259_vm0, %v215_v8  ;;  %1013 = vmatpush3.bf16.msra.mxu0 %v286_v11  ;;  %v208_v19 = vld [vmem:[%s1187_s5 + $0x48] sm:$0xff]  ;;  %v218_v20 = vpack.c.bf16 %v206_v17, %v205_v16  ;;  %v209_v22 = vld [vmem:[%s1187_s5 + $0x50] sm:$0xff]  ;;  %v210_v23 = vld [vmem:[%s1187_s5 + $0x58] sm:$0xff] }
  0x14   : > { %v219_v21 = vpack.c.bf16 %v208_v19, %v207_v18  ;;  %v211_v24 = vld [vmem:[%s1187_s5 + $0x60] sm:$0xff]  ;;  %v212_v25 = vld [vmem:[%s1187_s5 + $0x68] sm:$0xff]  ;;  %v220_v26 = vpack.c.bf16 %v210_v23, %v209_v22  ;;  %v213_v28 = vld [vmem:[%s1187_s5 + $0x70] sm:$0xff]  ;;  %1037 = vmatpush3.bf16.msra.mxu1 %v1118_v32  ;;  %1054 = vmatprep.subr.bf16.mxu0 %v1119_v33 }
  0x15   : > { %v221_v27 = vpack.c.bf16 %v212_v25, %v211_v24  ;;  %v214_v29 = vld [vmem:[%s1187_s5 + $0x78] sm:$0xff] }
  0x16   : > { %1015 = vmatmul.mubr.msk.bf16.vlgmr.msra.gmra.mrb[0].mxu0 %vm259_vm0, %v216_v14  ;;  %v222_v30 = vpack.c.bf16 %v214_v29, %v213_v28  ;;  %v1122_v29 = vld [vmem:[%s1293_s2 + $0x38] sm:$0xff]  }
  0x17   : > { %1018 = vmatprep.mubr.msk.bf16.mxu0 %vm259_vm0, %v217_v15  ;;  %1055 = vmatpush3.bf16.msra.mxu0 %v1119_v33 }
  0x18   : > { %1056 = vmatprep.subr.bf16.mxu0 %v1120_v34 }
  0x1b   : > { %1057 = vmatpush3.bf16.msra.mxu0 %v1120_v34 }
  0x1c   : > { %1058 = vmatprep.subr.bf16.mxu0 %v1121_v35 }
  0x1e   : > { %1019 = vmatmul.mubr.msk.bf16.gmra.mrb[4].mxu0 %vm259_vm0, %v218_v20 }
  0x1f   : > { %1022 = vmatprep.mubr.msk.bf16.mxu0 %vm259_vm0, %v219_v21  ;;  %1059 = vmatpush3.bf16.msra.mxu0 %v1121_v35 }
  0x20   : > { %1060 = vmatprep.subr.bf16.mxu0 %v1122_v29 }
  0x23   : > { %1061 = vmatpush3.bf16.msra.mxu0 %v1122_v29 }
  0x26   : > { %1023 = vmatmul.mubr.msk.bf16.gmra.mrb[8].mxu0 %vm259_vm0, %v220_v26 }
  0x27   : > { %1026 = vmatprep.mubr.msk.bf16.mxu0 %vm259_vm0, %v221_v27 }
  0x2e   : > { %1027 = vmatmul.mubr.msk.bf16.gmra.mrb[12].mxu0 %vm259_vm0, %v222_v30  ;;  %v924_v30 = vld [vmem:[%s1294_s3 + $0x1] ss:$0 sm:$0xff] }
  0xe9   : > { %v1016_v37 = vpop.f32.mrb[0].mxu0 }
  0xea   : > { %v331_v38 = vadd.f32 %v1016_v37, %v911_v36  ;;  %v322_v39 = vpop.f32.mrb[1].mxu0 }
  0xeb   : > { %v323_v40 = vadd.f32 %v911_v36, %v322_v39  ;;  %v1017_v41 = vpop.f32.mrb[2].mxu0 }
  0xec   : > { %v334_v42 = vadd.f32 %v1017_v41, %v911_v36  ;;  %v325_v43 = vpop.f32.mrb[3].mxu0  ;;  %v387_v45 = vmax.f32 %v331_v38, 0.0 }
  0xed   : > { %v326_v44 = vadd.f32 %v911_v36, %v325_v43  ;;  %v385_v47 = vmax.f32 %v323_v40, 0.0 }
  0xee   : > { %v388_v46 = vmax.f32 %v334_v42, 0.0 }
  0xef   : > { %v386_v48 = vmax.f32 %v326_v44, 0.0 }
  0xf0   : > { %v402_v49 = vpack.c.bf16 %v388_v46, %v387_v45 }
  0xf1   : > { %v1020_v50 = vpop.f32.mrb[4].mxu0  ;;  %v401_v51 = vpack.c.bf16 %v386_v48, %v385_v47 }
  0xf2   : > { %v347_v52 = vadd.f32 %v1020_v50, %v911_v36  ;;  %v338_v53 = vpop.f32.mrb[5].mxu0 }
  0xf3   : > { %v339_v54 = vadd.f32 %v911_v36, %v338_v53  ;;  %v1021_v55 = vpop.f32.mrb[6].mxu0  ;;  %1038 = vmatprep.mubr.msk.bf16.mxu1 %vm446_vm2, %v401_v51 }
  0xf4   : > { %v391_v56 = vmax.f32 %v347_v52, 0.0  ;;  %v350_v57 = vadd.f32 %v1021_v55, %v911_v36  ;;  %v341_v58 = vpop.f32.mrb[7].mxu0  ;;  %1039 = vmatmul.mubr.msk.bf16.vlgmr.msra.gmra.mrb[0].mxu1 %vm446_vm2, %v402_v49 }
  0xf5   : > { %v389_v59 = vmax.f32 %v339_v54, 0.0  ;;  %v342_v60 = vadd.f32 %v911_v36, %v341_v58 }
  0xf6   : > { %v392_v61 = vmax.f32 %v350_v57, 0.0 }
  0xf7   : > { %v390_v62 = vmax.f32 %v342_v60, 0.0 }
  0xf8   : > { %v404_v63 = vpack.c.bf16 %v392_v61, %v391_v56 }
  0xf9   : > { %v403_v0 = vpack.c.bf16 %v390_v62, %v389_v59  ;;  %v1024_v1 = vpop.f32.mrb[8].mxu0 }
  0xfa   : > { %v363_v2 = vadd.f32 %v1024_v1, %v911_v36  ;;  %v354_v3 = vpop.f32.mrb[9].mxu0 }
  0xfb   : > { %1042 = vmatprep.mubr.msk.bf16.mxu1 %vm446_vm2, %v403_v0  ;;  %v355_v4 = vadd.f32 %v911_v36, %v354_v3  ;;  %v1025_v5 = vpop.f32.mrb[10].mxu0 }
  0xfc   : > { %1043 = vmatmul.mubr.msk.bf16.gmra.mrb[4].mxu1 %vm446_vm2, %v404_v63  ;;  %v395_v6 = vmax.f32 %v363_v2, 0.0  ;;  %v366_v7 = vadd.f32 %v1025_v5, %v911_v36  ;;  %v357_v8 = vpop.f32.mrb[11].mxu0 }
  0xfd   : > { %v393_v9 = vmax.f32 %v355_v4, 0.0  ;;  %v358_v10 = vadd.f32 %v911_v36, %v357_v8 }
  0xfe   : > { %v396_v11 = vmax.f32 %v366_v7, 0.0 }
  0xff   : > { %v394_v12 = vmax.f32 %v358_v10, 0.0 }
 0x100   : > { %v406_v13 = vpack.c.bf16 %v396_v11, %v395_v6 }
 0x101   : > { %v405_v14 = vpack.c.bf16 %v394_v12, %v393_v9  ;;  %v1028_v15 = vpop.f32.mrb[12].mxu0 }
 0x102   : > { %v379_v16 = vadd.f32 %v1028_v15, %v911_v36  ;;  %v370_v17 = vpop.f32.mrb[13].mxu0 }
 0x103   : > { %1046 = vmatprep.mubr.msk.bf16.mxu1 %vm446_vm2, %v405_v14  ;;  %v371_v18 = vadd.f32 %v911_v36, %v370_v17  ;;  %v1029_v19 = vpop.f32.mrb[14].mxu0 }
 0x104   : > { %1047 = vmatmul.mubr.msk.bf16.gmra.mrb[8].mxu1 %vm446_vm2, %v406_v13  ;;  %v399_v20 = vmax.f32 %v379_v16, 0.0  ;;  %v382_v21 = vadd.f32 %v1029_v19, %v911_v36  ;;  %v373_v22 = vpop.f32.mrb[15].mxu0 }
 0x105   : > { %v397_v23 = vmax.f32 %v371_v18, 0.0  ;;  %v374_v24 = vadd.f32 %v911_v36, %v373_v22 }
 0x106   : > { %v400_v25 = vmax.f32 %v382_v21, 0.0 }
 0x107   : > { %v398_v26 = vmax.f32 %v374_v24, 0.0  ;;  %v777_v24 = vld [vmem:[%s1294_s3 + $0x4] sm:$0x1] }
 0x108   : > { %v408_v27 = vpack.c.bf16 %v400_v25, %v399_v20  ;;  %1099 = vpush %v777_v24  ;;  %v945_v25 = vld [vmem:[%s1294_s3 + $0x2] ss:$0 sm:$0xff] }
 0x109   : > { %v407_v28 = vpack.c.bf16 %v398_v26, %v397_v23  ;;  %v1131_v23 = vmov 0.0  }
 0x10a   : > { %1078 = vmatprep.subr.bf16.mxu1 %v1131_v23 }
 0x10b   : > { %1050 = vmatprep.mubr.msk.bf16.mxu1 %vm446_vm2, %v407_v28 }
 0x10c   : > { %1051 = vmatmul.mubr.msk.bf16.gmra.mrb[12].mxu1 %vm446_vm2, %v408_v27 }
 0x10d   : > { %1094 = vmatprep.mubr.msk.bf16.mxu1 %vm1132_vm3, %v1131_v23 }
 0x139   : > { %s1100_s6 = spop %1099 }
 0x1c7   : > { %v1040_v31 = vpop.f32.mrb[0].mxu1 }
 0x1c8   : > { %v514_v32 = vadd.f32 %v1040_v31, %v924_v30  ;;  %v505_v33 = vpop.f32.mrb[1].mxu1 }
 0x1c9   : > { %v506_v34 = vadd.f32 %v924_v30, %v505_v33  ;;  %v1041_v35 = vpop.f32.mrb[2].mxu1 }
 0x1ca   : > { %v517_v36 = vadd.f32 %v1041_v35, %v924_v30  ;;  %v508_v37 = vpop.f32.mrb[3].mxu1  ;;  %v570_v39 = vmax.f32 %v514_v32, 0.0 }
 0x1cb   : > { %v509_v38 = vadd.f32 %v924_v30, %v508_v37  ;;  %v568_v41 = vmax.f32 %v506_v34, 0.0 }
 0x1cc   : > { %v571_v40 = vmax.f32 %v517_v36, 0.0 }
 0x1cd   : > { %v569_v42 = vmax.f32 %v509_v38, 0.0 }
 0x1ce   : > { %v585_v43 = vpack.c.bf16 %v571_v40, %v570_v39 }
 0x1cf   : > { %v584_v44 = vpack.c.bf16 %v569_v42, %v568_v41  ;;  %v1044_v45 = vpop.f32.mrb[4].mxu1 }
 0x1d0   : > { %v530_v46 = vadd.f32 %v1044_v45, %v924_v30  ;;  %v521_v47 = vpop.f32.mrb[5].mxu1 }
 0x1d1   : > { %v522_v48 = vadd.f32 %v924_v30, %v521_v47  ;;  %v1045_v49 = vpop.f32.mrb[6].mxu1  ;;  %1062 = vmatprep.mubr.msk.bf16.mxu0 %vm446_vm2, %v584_v44 }
 0x1d2   : > { %v574_v50 = vmax.f32 %v530_v46, 0.0  ;;  %v533_v51 = vadd.f32 %v1045_v49, %v924_v30  ;;  %v524_v52 = vpop.f32.mrb[7].mxu1  ;;  %1063 = vmatmul.mubr.msk.bf16.vlgmr.msra.gmra.mrb[16].mxu0 %vm446_vm2, %v585_v43 }
 0x1d3   : > { %v572_v53 = vmax.f32 %v522_v48, 0.0  ;;  %v525_v54 = vadd.f32 %v924_v30, %v524_v52 }
 0x1d4   : > { %v575_v55 = vmax.f32 %v533_v51, 0.0 }
 0x1d5   : > { %v573_v56 = vmax.f32 %v525_v54, 0.0 }
 0x1d6   : > { %v587_v57 = vpack.c.bf16 %v575_v55, %v574_v50 }
 0x1d7   : > { %v586_v58 = vpack.c.bf16 %v573_v56, %v572_v53  ;;  %v1048_v59 = vpop.f32.mrb[8].mxu1 }
 0x1d8   : > { %v546_v60 = vadd.f32 %v1048_v59, %v924_v30  ;;  %v537_v61 = vpop.f32.mrb[9].mxu1 }
 0x1d9   : > { %1066 = vmatprep.mubr.msk.bf16.mxu0 %vm446_vm2, %v586_v58  ;;  %v538_v62 = vadd.f32 %v924_v30, %v537_v61  ;;  %v1049_v63 = vpop.f32.mrb[10].mxu1 }
 0x1da   : > { %1067 = vmatmul.mubr.msk.bf16.gmra.mrb[20].mxu0 %vm446_vm2, %v587_v57  ;;  %v578_v0 = vmax.f32 %v546_v60, 0.0  ;;  %v549_v1 = vadd.f32 %v1049_v63, %v924_v30  ;;  %v540_v2 = vpop.f32.mrb[11].mxu1 }
 0x1db   : > { %v576_v3 = vmax.f32 %v538_v62, 0.0  ;;  %v541_v4 = vadd.f32 %v924_v30, %v540_v2 }
 0x1dc   : > { %v579_v5 = vmax.f32 %v549_v1, 0.0 }
 0x1dd   : > { %v577_v6 = vmax.f32 %v541_v4, 0.0 }
 0x1de   : > { %v589_v7 = vpack.c.bf16 %v579_v5, %v578_v0 }
 0x1df   : > { %v588_v8 = vpack.c.bf16 %v577_v6, %v576_v3  ;;  %v1052_v9 = vpop.f32.mrb[12].mxu1 }
 0x1e0   : > { %v562_v10 = vadd.f32 %v1052_v9, %v924_v30  ;;  %v553_v11 = vpop.f32.mrb[13].mxu1 }
 0x1e1   : > { %1070 = vmatprep.mubr.msk.bf16.mxu0 %vm446_vm2, %v588_v8  ;;  %v554_v12 = vadd.f32 %v924_v30, %v553_v11  ;;  %v1053_v13 = vpop.f32.mrb[14].mxu1 }
 0x1e2   : > { %1071 = vmatmul.mubr.msk.bf16.gmra.mrb[24].mxu0 %vm446_vm2, %v589_v7  ;;  %v582_v14 = vmax.f32 %v562_v10, 0.0  ;;  %v565_v15 = vadd.f32 %v1053_v13, %v924_v30  ;;  %v556_v16 = vpop.f32.mrb[15].mxu1 }
 0x1e3   : > { %v580_v17 = vmax.f32 %v554_v12, 0.0  ;;  %v557_v18 = vadd.f32 %v924_v30, %v556_v16 }
 0x1e4   : > { %v583_v19 = vmax.f32 %v565_v15, 0.0 }
 0x1e5   : > { %v581_v20 = vmax.f32 %v557_v18, 0.0 }
 0x1e6   : > { %v591_v21 = vpack.c.bf16 %v583_v19, %v582_v14 }
 0x1e7   : > { %v590_v22 = vpack.c.bf16 %v581_v20, %v580_v17 }
 0x1e9   : > { %1074 = vmatprep.mubr.msk.bf16.mxu0 %vm446_vm2, %v590_v22 }
 0x1ea   : > { %1075 = vmatmul.mubr.msk.bf16.gmra.mrb[28].mxu0 %vm446_vm2, %v591_v21 }
 0x2a5   : > { %v1064_v26 = vpop.f32.mrb[16].mxu0 }
 0x2a6   : > { %v697_v27 = vadd.f32 %v1064_v26, %v945_v25  ;;  %v688_v28 = vpop.f32.mrb[17].mxu0 }
 0x2a7   : > { %v689_v29 = vadd.f32 %v945_v25, %v688_v28  ;;  %v1065_v30 = vpop.f32.mrb[18].mxu0 }
 0x2a8   : > { %v700_v31 = vadd.f32 %v1065_v30, %v945_v25  ;;  %v691_v32 = vpop.f32.mrb[19].mxu0  ;;  %v753_v34 = vmax.f32 %v697_v27, 0.0  ;;  %v767_v27 = vld [vmem:[%s1294_s3] sm:$0xff] }
 0x2a9   : > { %v692_v33 = vadd.f32 %v945_v25, %v691_v32  ;;  %v751_v36 = vmax.f32 %v689_v29, 0.0  ;;  %v768_v28 = vpack.c.bf16 %v767_v27, %v767_v27  ;;  %v780_v29 = vstv %s1100_s6 }
 0x2aa   : > { %v754_v35 = vmax.f32 %v700_v31, 0.0 }
 0x2ab   : > { %v752_v37 = vmax.f32 %v692_v33, 0.0 }
 0x2ac   : > { %v770_v38 = vpack.c.bf16 %v754_v35, %v753_v34 }
 0x2ad   : > { %v769_v39 = vpack.c.bf16 %v752_v37, %v751_v36  ;;  %v1068_v40 = vpop.f32.mrb[20].mxu0 }
 0x2ae   : > { %v713_v41 = vadd.f32 %v1068_v40, %v945_v25  ;;  %v704_v42 = vpop.f32.mrb[21].mxu0  ;;  %v789_v58 = vsel %vm446_vm2, %v770_v38, 0 }
 0x2af   : > { %v705_v43 = vadd.f32 %v945_v25, %v704_v42  ;;  %v1069_v44 = vpop.f32.mrb[22].mxu0  ;;  %v786_v45 = vsel %vm446_vm2, %v769_v39, 0 }
 0x2b0   : > { %v716_v46 = vadd.f32 %v1069_v44, %v945_v25  ;;  %v707_v47 = vpop.f32.mrb[23].mxu0  ;;  %1079 = vmatpush3.bf16.xpose.msra.mxu1 %v786_v45  ;;  %v757_v49 = vmax.f32 %v713_v41, 0.0 }
 0x2b1   : > { %v708_v48 = vadd.f32 %v945_v25, %v707_v47  ;;  %1080 = vmatprep.subr.bf16.mxu1 %v1131_v23  ;;  %v755_v51 = vmax.f32 %v705_v43, 0.0 }
 0x2b2   : > { %v758_v50 = vmax.f32 %v716_v46, 0.0 }
 0x2b3   : > { %v756_v52 = vmax.f32 %v708_v48, 0.0 }
 0x2b4   : > { %v772_v53 = vpack.c.bf16 %v758_v50, %v757_v49 }
 0x2b5   : > { %v771_v54 = vpack.c.bf16 %v756_v52, %v755_v51  ;;  %v1072_v55 = vpop.f32.mrb[24].mxu0 }
 0x2b6   : > { %v729_v56 = vadd.f32 %v1072_v55, %v945_v25  ;;  %v720_v57 = vpop.f32.mrb[25].mxu0  ;;  %v795_v21 = vsel %vm446_vm2, %v772_v53, 0 }
 0x2b7   : > { %v721_v59 = vadd.f32 %v945_v25, %v720_v57  ;;  %v1073_v60 = vpop.f32.mrb[26].mxu0  ;;  %v792_v9 = vsel %vm446_vm2, %v771_v54, 0 }
 0x2b8   : > { %1081 = vmatpush3.bf16.xpose.msra.mxu1 %v789_v58  ;;  %v761_v61 = vmax.f32 %v729_v56, 0.0  ;;  %v732_v62 = vadd.f32 %v1073_v60, %v945_v25  ;;  %v723_v63 = vpop.f32.mrb[27].mxu0 }
 0x2b9   : > { %v759_v0 = vmax.f32 %v721_v59, 0.0  ;;  %v724_v1 = vadd.f32 %v945_v25, %v723_v63  ;;  %1082 = vmatprep.subr.bf16.mxu1 %v1131_v23 }
 0x2ba   : > { %v762_v2 = vmax.f32 %v732_v62, 0.0 }
 0x2bb   : > { %v760_v3 = vmax.f32 %v724_v1, 0.0 }
 0x2bc   : > { %v774_v4 = vpack.c.bf16 %v762_v2, %v761_v61 }
 0x2bd   : > { %v773_v5 = vpack.c.bf16 %v760_v3, %v759_v0  ;;  %v1076_v6 = vpop.f32.mrb[28].mxu0 }
 0x2be   : > { %v745_v7 = vadd.f32 %v1076_v6, %v945_v25  ;;  %v736_v8 = vpop.f32.mrb[29].mxu0  ;;  %v801_v24 = vsel %vm446_vm2, %v774_v4, 0 }
 0x2bf   : > { %v737_v10 = vadd.f32 %v945_v25, %v736_v8  ;;  %v1077_v11 = vpop.f32.mrb[30].mxu0  ;;  %v798_v22 = vsel %vm446_vm2, %v773_v5, 0 }
 0x2c0   : > { %1083 = vmatpush3.bf16.xpose.msra.mxu1 %v792_v9  ;;  %v765_v12 = vmax.f32 %v745_v7, 0.0  ;;  %v748_v13 = vadd.f32 %v1077_v11, %v945_v25  ;;  %v739_v14 = vpop.f32.mrb[31].mxu0 }
 0x2c1   : > { %1084 = vmatprep.subr.bf16.mxu1 %v1131_v23  ;;  %v763_v15 = vmax.f32 %v737_v10, 0.0  ;;  %v740_v16 = vadd.f32 %v945_v25, %v739_v14 }
 0x2c2   : > { %v766_v17 = vmax.f32 %v748_v13, 0.0 }
 0x2c3   : > { %v764_v18 = vmax.f32 %v740_v16, 0.0 }
 0x2c4   : > { %v776_v19 = vpack.c.bf16 %v766_v17, %v765_v12 }
 0x2c5   : > { %v775_v20 = vpack.c.bf16 %v764_v18, %v763_v15 }
 0x2c6   : > { %v807_v26 = vsel %vm446_vm2, %v776_v19, 0 }
 0x2c7   : > { %v804_v25 = vsel %vm446_vm2, %v775_v20, 0 }
 0x2c8   : > { %1085 = vmatpush3.bf16.xpose.msra.mxu1 %v795_v21 }
 0x2c9   : > { %1086 = vmatprep.subr.bf16.mxu1 %v1131_v23 }
 0x2d0   : > { %1087 = vmatpush3.bf16.xpose.msra.mxu1 %v798_v22 }
 0x2d1   : > { %1088 = vmatprep.subr.bf16.mxu1 %v1131_v23 }
 0x2d8   : > { %1089 = vmatpush3.bf16.xpose.msra.mxu1 %v801_v24 }
 0x2d9   : > { %1090 = vmatprep.subr.bf16.mxu1 %v1131_v23 }
 0x2e0   : > { %1091 = vmatpush3.bf16.xpose.msra.mxu1 %v804_v25 }
 0x2e1   : > { %1092 = vmatprep.subr.bf16.mxu1 %v1131_v23 }
 0x2e8   : > { %1093 = vmatpush3.bf16.xpose.msra.mxu1 %v807_v26 }
 0x2ef   : > { %1095 = vmatmul.mubr.msk.bf16.vlgmr.msra.gmra.mrb[16].mxu1 %vm446_vm2, %v768_v28 }
 0x3c2   : > { %v843_v23 = vpop.f32.mrb[16].mxu1 }
 0x3c3   : > { %v844_v30 = vadd.f32 %v843_v23, %v780_v29  ;;  %v1096_v31 = vpop.f32.mrb[17].mxu1 }
 0x3c4   : > { %v846_v32 = vpop.f32.mrb[18].mxu1 }
 0x3c5   : > { %849 = vst [vmem:[%s197_s10] sm:$0xff] %v844_v30  ;;  %v1097_v33 = vpop.f32.mrb[19].mxu1 }
 0x3c6 PF: > { %s14_s15 = sadd.s32 1, %s1129_s15  }
 0x3c7   : > { %p11_p5 = scmp.ge.s32.totalorder %s14_s15, 4  }
 0x3c9   :  { %13 = sbr.rel (!%p11_p5) target bundleno = 1 (0x1), region = 67 }

</bundles_post_ra>
